<compile_context>
chip_gen: v7x
topology: tpu7x:2x2x1
jax: 0.10.0
libtpu: 0.0.40
codegen_flags: <defaults>
</compile_context>

<pallas_src>
from functools import partial

import jax
import jax.numpy as jnp
from jax.experimental import pallas as pl
from jax.experimental.pallas import tpu as pltpu

LANES = 128            # lane width (last dim of every block)
SUBLANES = 8           # f32 sublane granule
MAX_TILE_ROWS = 1024   # 1024 x 128 f32 = 512 KiB per input block (fits v7x VMEM easily)
EPS = 1e-4             # matches the PyTorch module's 0.0001


def _mrae_partial_kernel(x_ref, y_ref, out_ref, *, tile_rows, n_elems):
    i = pl.program_id(0)

    x = x_ref[...].astype(jnp.float32)
    y = y_ref[...].astype(jnp.float32)

    # Flat element index of every lane in the original flattened tensor; used to
    # mask the pad tail and any out-of-bounds rows of a partial last block.
    r = jax.lax.broadcasted_iota(jnp.int32, (tile_rows, LANES), 0)
    c = jax.lax.broadcasted_iota(jnp.int32, (tile_rows, LANES), 1)
    flat = (i * tile_rows + r) * LANES + c
    valid = flat < n_elems

    num = jnp.where(valid, jnp.abs(x - y + EPS), 0.0)
    den = jnp.where(valid, y + EPS, 1.0)   # keep denominator finite for masked lanes
    err = num / den

    # Fold the (tile_rows, 128) errors into one (8, 128) vreg-shaped partial sum:
    # pure VPU adds in the hot loop, no per-step cross-lane/XLU reduction.
    out_ref[...] = err.reshape(tile_rows // SUBLANES, SUBLANES, LANES).sum(axis=0)


def loss_mrae(outputs, label):
    """MRAE loss matching torch: mean(|outputs - label + 1e-4| / (label + 1e-4))."""
    assert outputs.shape == label.shape, "outputs and label must have the same shape"
    n = outputs.size

    # Keep native dtype (bf16/f16/f32); cast to f32 inside the kernel.
    x = outputs.reshape(-1)
    y = label.reshape(-1)

    # Pad only up to the (8, 128) granule (< 1024 extra elements, and a no-op for
    # typical tensor sizes); padded values are masked out in-kernel.
    granule = SUBLANES * LANES
    padded = pl.cdiv(n, granule) * granule
    if padded != n:
        x = jnp.pad(x, (0, padded - n))
        y = jnp.pad(y, (0, padded - n))

    rows = padded // LANES                  # multiple of 8
    x2 = x.reshape(rows, LANES)
    y2 = y.reshape(rows, LANES)

    tile_rows = min(MAX_TILE_ROWS, rows)    # multiple of 8 by construction
    num_blocks = pl.cdiv(rows, tile_rows)   # last block may be partial (masked in-kernel)

    partials = pl.pallas_call(
        partial(_mrae_partial_kernel, tile_rows=tile_rows, n_elems=n),
        out_shape=jax.ShapeDtypeStruct((num_blocks * SUBLANES, LANES), jnp.float32),
        grid_spec=pltpu.PrefetchScalarGridSpec(
            num_scalar_prefetch=0,
            grid=(num_blocks,),
            in_specs=[
                pl.BlockSpec((tile_rows, LANES), lambda i: (i, 0)),
                pl.BlockSpec((tile_rows, LANES), lambda i: (i, 0)),
            ],
            out_specs=pl.BlockSpec((SUBLANES, LANES), lambda i: (i, 0)),
        ),
        compiler_params=pltpu.CompilerParams(
            # Independent per-block partial sums -> fully parallel grid; on v7x the
            # two TensorCores each take a share of the row blocks. On v5e/v6e this
            # costs nothing (single TC iterates the grid).
            dimension_semantics=("parallel",),
        ),
    )(x2, y2)

    # Tiny final reduction over (num_blocks*8, 128) f32 partials (<1% of input bytes).
    return jnp.sum(partials) / n


def _mrae_ref(outputs, label):
    return jnp.mean(jnp.abs(outputs - label + EPS) / (label + EPS))


if __name__ == "__main__":
    key = jax.random.PRNGKey(0)
    k1, k2, k3, k4 = jax.random.split(key, 4)

    # Typical NCHW-shaped prediction / target (positive values, as for spectral MRAE).
    outputs = jax.random.uniform(k1, (2, 4, 16, 16), dtype=jnp.float32, minval=0.0, maxval=1.0)
    label = jax.random.uniform(k2, (2, 4, 16, 16), dtype=jnp.float32, minval=0.1, maxval=1.0)

    mrae = loss_mrae(outputs, label)
    jax.block_until_ready(mrae)
    ref = _mrae_ref(outputs, label)
    assert jnp.allclose(mrae, ref, rtol=1e-5, atol=1e-6), (mrae, ref)

    # Also exercise the masked-tail path (size not a multiple of 8*128).
    o2 = jax.random.uniform(k3, (3, 5, 7), dtype=jnp.float32, minval=0.0, maxval=1.0)
    l2 = jax.random.uniform(k4, (3, 5, 7), dtype=jnp.float32, minval=0.1, maxval=1.0)
    mrae2 = loss_mrae(o2, l2)
    jax.block_until_ready(mrae2)
    ref2 = _mrae_ref(o2, l2)
    assert jnp.allclose(mrae2, ref2, rtol=1e-5, atol=1e-6), (mrae2, ref2)

    print("KERNEL_OK")
</pallas_src>

<mosaic_0001>
module attributes {stable_mosaic.version = 11 : i64} {
  func.func @_mrae_partial_kernel(%arg0: i32, %arg1: memref<16x128xf32, #tpu.memory_space<vmem>>, %arg2: memref<16x128xf32, #tpu.memory_space<vmem>>, %arg3: memref<8x128xf32, #tpu.memory_space<vmem>>) attributes {dimension_semantics = [#tpu.dimension_semantics<parallel>], iteration_bounds = array<i64: 1>, scalar_prefetch = 0 : i64, scratch_operands = 0 : i64, tpu.core_type = #tpu.core_type<tc>, window_params = [{transform_indices = @transform_0, window_bounds = array<i64: 16, 128>}, {transform_indices = @transform_1, window_bounds = array<i64: 16, 128>}, {transform_indices = @transform_2, window_bounds = array<i64: 8, 128>}]} {
    %c0 = arith.constant 0 : index
    %c0_0 = arith.constant 0 : index
    %0 = vector.load %arg1[%c0, %c0_0] : memref<16x128xf32, #tpu.memory_space<vmem>>, vector<16x128xf32>
    %c0_1 = arith.constant 0 : index
    %c0_2 = arith.constant 0 : index
    %1 = vector.load %arg2[%c0_1, %c0_2] : memref<16x128xf32, #tpu.memory_space<vmem>>, vector<16x128xf32>
    %2 = tpu.iota {dimensions = array<i32: 0>} : vector<16x128xi32>
    %3 = tpu.iota {dimensions = array<i32: 1>} : vector<16x128xi32>
    %c16_i32 = arith.constant 16 : i32
    %4 = arith.muli %arg0, %c16_i32 : i32
    %5 = vector.broadcast %4 : i32 to vector<16x128xi32>
    %6 = arith.addi %5, %2 : vector<16x128xi32>
    %c128_i32 = arith.constant 128 : i32
    %7 = vector.broadcast %c128_i32 : i32 to vector<16x128xi32>
    %8 = arith.muli %6, %7 : vector<16x128xi32>
    %9 = arith.addi %8, %3 : vector<16x128xi32>
    %c2048_i32 = arith.constant 2048 : i32
    %10 = vector.broadcast %c2048_i32 : i32 to vector<16x128xi32>
    %11 = arith.cmpi slt, %9, %10 : vector<16x128xi32>
    %12 = arith.subf %0, %1 : vector<16x128xf32>
    %cst = arith.constant 9.99999974E-5 : f32
    %13 = vector.broadcast %cst : f32 to vector<16x128xf32>
    %14 = arith.addf %12, %13 : vector<16x128xf32>
    %15 = math.absf %14 : vector<16x128xf32>
    %cst_3 = arith.constant 0.000000e+00 : f32
    %16 = vector.broadcast %cst_3 : f32 to vector<16x128xf32>
    %17 = arith.select %11, %15, %16 : vector<16x128xi1>, vector<16x128xf32>
    %cst_4 = arith.constant 9.99999974E-5 : f32
    %18 = vector.broadcast %cst_4 : f32 to vector<16x128xf32>
    %19 = arith.addf %1, %18 : vector<16x128xf32>
    %cst_5 = arith.constant 1.000000e+00 : f32
    %20 = vector.broadcast %cst_5 : f32 to vector<16x128xf32>
    %21 = arith.select %11, %19, %20 : vector<16x128xi1>, vector<16x128xf32>
    %22 = arith.divf %17, %21 : vector<16x128xf32>
    %23 = vector.shape_cast %22 : vector<16x128xf32> to vector<2x8x128xf32>
    %cst_6 = arith.constant dense<0.000000e+00> : vector<8x128xf32>
    %24 = vector.multi_reduction <add>, %23, %cst_6 [0] : vector<2x8x128xf32> to vector<8x128xf32>
    %c0_7 = arith.constant 0 : index
    %c0_8 = arith.constant 0 : index
    %25 = vector.load %arg3[%c0_7, %c0_8] : memref<8x128xf32, #tpu.memory_space<vmem>>, vector<8x128xf32>
    tpu.vector_store %arg3[%c0_7, %c0_8], %24 {strides = array<i32>} : memref<8x128xf32, #tpu.memory_space<vmem>>, vector<8x128xf32>,
    return
  }
  func.func @transform_0(%arg0: i32) -> (i32, i32) {
    %c0_i32 = arith.constant 0 : i32
    %c0_i32_0 = arith.constant 0 : i32
    return %arg0, %c0_i32 : i32, i32
  }
  func.func @transform_1(%arg0: i32) -> (i32, i32) {
    %c0_i32 = arith.constant 0 : i32
    %c0_i32_0 = arith.constant 0 : i32
    return %arg0, %c0_i32 : i32, i32
  }
  func.func @transform_2(%arg0: i32) -> (i32, i32) {
    %c0_i32 = arith.constant 0 : i32
    %c0_i32_0 = arith.constant 0 : i32
    return %arg0, %c0_i32 : i32, i32
  }
}

</mosaic_0001>

<bundles_post_ra>
// kernel: tpu_custom_call.1
= control target key start
LH: loop header
LB: loop body
LE: loop exit
PB: predicated region body
PF: predicated region fallthrough
CT: control target
= control target key end

     0   :  { %7 = vsyncpa [#allocation3], 0  ;;  %s230_s0 = inlined_call_operand.hbm [shape: f32[16,128], index: 0, kind: input, shape index: {}]   ;;  %s231_s1 = inlined_call_operand.hbm [shape: f32[16,128], index: 1, kind: input, shape index: {}]   ;;  %s232_s2 = inlined_call_operand.hbm [shape: f32[8,128], index: 2, kind: output, shape index: {}]  }
   0x1   :  { %8 = vsyncpa [#allocation6], 0 }
   0x2   :  { %9 = vsyncpa [#allocation4], 0  ;;  %s174_s9 = smov [#allocation2]   ;;  %s102_s13 = scalar_lea.hbm %s230_s0, 256 }
   0x3   :  { %s15_s10 = sshll.u32 %s174_s9, 4  ;;  %p103_p0 = scmp.ne.s32.totalorder %s230_s0, %s102_s13  ;;  %s16_s10 = int_to_ptr.vmem [resolvable:$true] %s15_s10 }
   0x4   :  { %p106_p1 = scmp.lt.u32.totalorder %s102_s13, %s230_s0 }
   0x6   :  { %p108_p2 = pnand %p106_p1, %p103_p0 }
   0x8   :  { %111 = shalt.err (!%p108_p2)
}
   0x9   :  { %s112_s18 = scalar_lea.vmem %s16_s10, 256  ;;  %p117_p4 = scmp.lt.s32.totalorder %s16_s10, %s16_s10 }
   0xa   :  { %p113_p3 = scmp.ne.s32.totalorder %s16_s10, %s112_s18  ;;  %p118_p5 = scmp.lt.s32.totalorder %s112_s18, %s112_s18 }
   0xc   :  { %p119_p6 = por %p118_p5, %p117_p4 }
   0xe   :  { %p120_p7 = pnand %p119_p6, %p113_p3 }
  0x10   :  { %123 = shalt.err (!%p120_p7)
}
  0x11   :  { %s175_s19 = smov 128   ;;  %s176_s20 = smov 8  }
  0x12   :  { %21 = dma.hbm_to_vmem [thread:$0]  %s230_s0, 256, %s16_s10, [#allocation3], %s175_s19, %s175_s19, %s176_s20  }
  0x13   :  { %s177_s23 = smov [#allocation5]   ;;  %s124_s27 = scalar_lea.hbm %s231_s1, 256 }
  0x14   :  { %s27_s24 = sshll.u32 %s177_s23, 4  ;;  %p125_p8 = scmp.ne.s32.totalorder %s231_s1, %s124_s27  ;;  %s28_s24 = int_to_ptr.vmem [resolvable:$true] %s27_s24 }
  0x15   :  { %p128_p9 = scmp.lt.u32.totalorder %s124_s27, %s231_s1 }
  0x17   :  { %p130_p10 = pnand %p128_p9, %p125_p8 }
  0x19   :  { %133 = shalt.err (!%p130_p10)
}
  0x1a   :  { %s134_s4 = scalar_lea.vmem %s28_s24, 256  ;;  %p139_p12 = scmp.lt.s32.totalorder %s28_s24, %s28_s24 }
  0x1b   :  { %p135_p11 = scmp.ne.s32.totalorder %s28_s24, %s134_s4  ;;  %p140_p13 = scmp.lt.s32.totalorder %s134_s4, %s134_s4 }
  0x1d   :  { %p141_p0 = por %p140_p13, %p139_p12 }
  0x1f   :  { %p142_p1 = pnand %p141_p0, %p135_p11 }
  0x21   :  { %145 = shalt.err (!%p142_p1)
}
  0x22   :  { %33 = dma.hbm_to_vmem [thread:$0]  %s231_s1, 256, %s28_s24, [#allocation6], %s175_s19, %s175_s19, %s176_s20  }
  0x23   :  { %168 = dma.done.wait [#allocation3], 256  }
  0x24   :  { %169 = vsyncadd [#allocation3], 4294967040 }
  0x25   :  { %170 = dma.done.wait [#allocation6], 256  }
  0x26   :  { %171 = vsyncadd [#allocation6], 4294967040  ;;  %v44_v0 = vlaneseq  ;;  %v40_v7 = vld [vmem:[#allocation2] sm:$0xff]  ;;  %v41_v8 = vld [vmem:[#allocation2 + $0x8] sm:$0xff]  ;;  %s178_s1 = smov [#allocation7]  }
  0x27   :  { %v42_v9 = vld [vmem:[#allocation5] sm:$0xff]  ;;  %v43_v10 = vld [vmem:[#allocation5 + $0x8] sm:$0xff]  ;;  %s83_s6 = sshll.u32 %s178_s1, 4  ;;  %s84_s6 = int_to_ptr.vmem [resolvable:$true] %s83_s6 }
  0x28   :  { %v45_v1 = vshrl.u32 %v44_v0, 7  ;;  %v48_v2 = vand.u32 127, %v44_v0  ;;  %v59_v12 = vsub.f32 %v40_v7, %v42_v9  ;;  %v67_v13 = vadd.f32 0.0001, %v42_v9  ;;  %s146_s7 = scalar_lea.vmem %s84_s6, 128  ;;  %p151_p3 = scmp.lt.s32.totalorder %s84_s6, %s84_s6 }
  0x29   :  { %v60_v14 = vsub.f32 %v41_v8, %v43_v10  ;;  %v68_v15 = vadd.f32 0.0001, %v43_v10  ;;  %p147_p2 = scmp.ne.s32.totalorder %s84_s6, %s146_s7  ;;  %p152_p4 = scmp.lt.s32.totalorder %s146_s7, %s146_s7 }
  0x2a   :  { %v46_v3 = vadd.s32 8, %v45_v1  ;;  %v53_v4 = vmul.u32 128, %v45_v1  ;;  %v61_v17 = vadd.f32 0.0001, %v59_v12 }
  0x2b   :  { %v62_v19 = vadd.f32 0.0001, %v60_v14  ;;  %p153_p5 = por %p152_p4, %p151_p3 }
  0x2c   :  { %v54_v5 = vmul.u32 128, %v46_v3  ;;  %v55_v6 = vadd.s32 %v53_v4, %v48_v2  ;;  %v63_v20 = vand.u32 2147483647, %v61_v17 }
  0x2d   :  { %v64_v21 = vand.u32 2147483647, %v62_v19  ;;  %p154_p6 = pnand %p153_p5, %p147_p2 }
  0x2e   :  { %v56_v11 = vadd.s32 %v54_v5, %v48_v2  ;;  %vm57_vm0 = vcmp.lt.s32.totalorder %v55_v6, 2048 }
  0x2f   :  { %v69_v16 = vsel %vm57_vm0, %v67_v13, 1.0  ;;  %v65_v22 = vsel %vm57_vm0, %v63_v20, 0.0 }
  0x30   :  { %vm58_vm1 = vcmp.lt.s32.totalorder %v56_v11, 2048  ;;  %98 = vrcp.f32 %v69_v16 }
  0x31   :  { %v70_v18 = vsel %vm58_vm1, %v68_v15, 1.0  ;;  %v66_v23 = vsel %vm58_vm1, %v64_v21, 0.0 }
  0x32   :  { %100 = vrcp.f32 %v70_v18 }
  0x3a   :  { %v99_v24 = vpop.eup %98 }
  0x3b   :  { %v72_v26 = vmul.f32 %v99_v24, %v65_v22 }
  0x3c   :  { %v101_v25 = vpop.eup %100 }
  0x3d   :  { %v74_v27 = vmul.f32 %v101_v25, %v66_v23 }
  0x3f   :  { %v75_v28 = vadd.f32 %v74_v27, %v72_v26 }
  0x41   :  { %76 = vst [vmem:[#allocation7] sm:$0xff] %v75_v28 }
  0x42   :  { %157 = shalt.err (!%p154_p6)
}
  0x43   :  { %s158_s10 = scalar_lea.hbm %s232_s2, 128 }
  0x44   :  { %p159_p7 = scmp.ne.s32.totalorder %s232_s2, %s158_s10  ;;  %p162_p8 = scmp.lt.u32.totalorder %s158_s10, %s232_s2 }
  0x46   :  { %p164_p9 = pnand %p162_p8, %p159_p7 }
  0x48   :  { %167 = shalt.err (!%p164_p9)
}
  0x49   :  { %86 = dma.vmem_to_hbm [thread:$0]  %s84_s6, 128, %s232_s2, [#allocation4]  }
  0x4a   :  { %172 = dma.done.wait [#allocation4], 128  }
  0x4b   :  { %173 = vsyncadd [#allocation4], 4294967168 }
  0x4c   :  { %90 = vsyncpa [#allocation3], 1 }
  0x4d   :  { %91 = vsyncpa [#allocation6], 1 }
  0x4e   :  { %92 = vsyncpa [#allocation4], 1 }

</bundles_post_ra>
